<compile_context>
chip_gen: v7x
topology: tpu7x:2x2x1
jax: 0.10.0
libtpu: 0.0.40
codegen_flags: <defaults>
</compile_context>

<pallas_src>
import jax
import jax.numpy as jnp
from jax.experimental import pallas as pl
from jax.experimental.pallas import tpu as pltpu

_BN_EPS = 1e-5


# ----------------------------- Pallas kernel ------------------------------ #
def _fused_layer_kernel(w_ref, p_ref, b_ref, g_ref, beta_ref, a_ref, o_ref):
    # ConvTranspose2d as an MXU matmul: [Cout, K] @ [K, M] -> [Cout, M].
    y = jnp.dot(w_ref[...], p_ref[...], preferred_element_type=jnp.float32)
    y = y + b_ref[...]                       # conv bias, [Cout, 1] broadcast

    # BatchNorm2d (training mode): batch statistics over the M = N*OH*OW lane
    # axis per channel row; biased variance, centered (two-pass) form.
    inv_m = 1.0 / y.shape[1]
    mean = jnp.sum(y, axis=1, keepdims=True) * inv_m          # [Cout, 1]
    d = y - mean
    var = jnp.sum(d * d, axis=1, keepdims=True) * inv_m       # [Cout, 1]
    yn = d * jax.lax.rsqrt(var + _BN_EPS)
    yb = g_ref[...] * yn + beta_ref[...]

    # PReLU with a single shared alpha (nn.PReLU() default), scalar from SMEM.
    alpha = a_ref[0]
    o_ref[...] = jnp.where(yb >= 0.0, yb, alpha * yb)


def _run_fused_layer(w_t, patches, bias, gamma, beta, alpha):
    cout = w_t.shape[0]
    m = patches.shape[1]
    vmem = pl.BlockSpec(memory_space=pltpu.MemorySpace.VMEM)
    smem = pl.BlockSpec(memory_space=pltpu.MemorySpace.SMEM)
    return pl.pallas_call(
        _fused_layer_kernel,
        out_shape=jax.ShapeDtypeStruct((cout, m), jnp.float32),
        in_specs=[vmem, vmem, vmem, vmem, vmem, smem],
        out_specs=vmem,
    )(w_t, patches, bias, gamma, beta, alpha)


# ------------------------------ JAX glue ----------------------------------- #
def _conv_transpose_patches_cnhw(x_cnhw, kernel, stride, padding, output_padding):
    """Dilate + pad + im2col for ConvTranspose2d, channel-leading layout.

    x_cnhw: (C, N, H, W).  Returns patches [C*KH*KW, N*OH*OW] with the K axis
    ordered (ci, i, j) and the M axis ordered (n, oh, ow), plus (N, OH, OW).
    """
    C, N, H, W = x_cnhw.shape
    KH = KW = kernel
    SH = SW = stride
    PH = PW = padding
    OPH, OPW = output_padding

    # Equivalent forward-conv padding (requires k-1-p >= 0, true here);
    # lax.pad does the fractional-stride zero insertion and the edge padding
    # in a single op via interior padding.
    pt, pb = KH - 1 - PH, KH - 1 - PH + OPH
    pleft, pright = KW - 1 - PW, KW - 1 - PW + OPW
    xp = jax.lax.pad(
        x_cnhw, jnp.zeros((), x_cnhw.dtype),
        ((0, 0, 0), (0, 0, 0), (pt, pb, SH - 1), (pleft, pright, SW - 1)))

    Hp, Wp = xp.shape[2], xp.shape[3]
    OH = Hp - KH + 1          # = (H-1)*SH - 2*PH + KH + OPH
    OW = Wp - KW + 1          # = (W-1)*SW - 2*PW + KW + OPW

    # patches[(ci, i, j), (n, oh, ow)] = xp[ci, n, oh + i, ow + j]
    slices = [xp[:, :, i:i + OH, j:j + OW]
              for i in range(KH) for j in range(KW)]
    patches = jnp.stack(slices, axis=1)                 # (C, KH*KW, N, OH, OW)
    patches = patches.reshape(C * KH * KW, N * OH * OW)  # row-major: free
    return patches, (N, OH, OW)


def _ref_conv_transpose_nchw(x, weight, stride, padding, output_padding):
    """Independent ConvTranspose2d reference via lax.conv_general_dilated."""
    KH, KW = weight.shape[2], weight.shape[3]
    w = jnp.flip(weight, (2, 3)).transpose(1, 0, 2, 3)   # (Cout, Cin, KH, KW)
    pad = ((KH - 1 - padding, KH - 1 - padding + output_padding[0]),
           (KW - 1 - padding, KW - 1 - padding + output_padding[1]))
    return jax.lax.conv_general_dilated(
        x, w, window_strides=(1, 1), padding=pad,
        lhs_dilation=(stride, stride),
        dimension_numbers=('NCHW', 'OIHW', 'NCHW'))


# ------------------------------- Decoder ----------------------------------- #
class DecoderPallas:
    """JAX/Pallas port of the PyTorch Decoder module.

    `layers[i] = ((cin, cout), kernel_size, stride, padding)`; layer 1 gets
    output_padding=(1, 0), exactly like the PyTorch __init__.
    """

    def __init__(self, layers, key, is_excitation=False):
        self.is_excitation = is_excitation
        self.params = []
        for i, ((cin, cout), k, s, p) in enumerate(layers):
            key, k1, k2, k3, k4 = jax.random.split(key, 5)
            wt = 0.1 * jax.random.normal(k1, (cin, cout, k, k), jnp.float32)
            b = 0.1 * jax.random.normal(k2, (cout,), jnp.float32)
            gamma = 1.0 + 0.1 * jax.random.normal(k3, (cout,), jnp.float32)
            beta = 0.1 * jax.random.normal(k4, (cout,), jnp.float32)
            alpha = jnp.full((1,), 0.25, jnp.float32)     # nn.PReLU() default
            out_pad = (1, 0) if i == 1 else (0, 0)
            # Precompute the lane-dense matmul LHS once: spatially flipped
            # weight flattened to (Cout, Cin*KH*KW) with K ordered (ci, i, j).
            w_t = (jnp.flip(wt, (2, 3))
                   .transpose(1, 0, 2, 3)
                   .reshape(cout, cin * k * k))
            self.params.append(dict(
                wt=wt, w_t=w_t,
                b=b.reshape(cout, 1), gamma=gamma.reshape(cout, 1),
                beta=beta.reshape(cout, 1), alpha=alpha,
                k=k, s=s, p=p, op=out_pad, cout=cout))

    # Pallas path: channel-leading [C, N, H, W] layout kept across layers.
    def __call__(self, x, medium_array):
        xc = x.transpose(1, 0, 2, 3)                       # NCHW -> CNHW (once)
        skips = [a.transpose(1, 0, 2, 3) for a in medium_array]
        for i in range(3):
            a = skips[2 - i]
            xc = jnp.concatenate((xc, a), axis=0)          # cat along channels
            prm = self.params[i]
            patches, (N, OH, OW) = _conv_transpose_patches_cnhw(
                xc, prm['k'], prm['s'], prm['p'], prm['op'])
            y = _run_fused_layer(prm['w_t'], patches, prm['b'],
                                 prm['gamma'], prm['beta'], prm['alpha'])
            xc = y.reshape(prm['cout'], N, OH, OW)         # free reshape
        return xc.transpose(1, 0, 2, 3)                    # back to NCHW (once)

    # Pure-JAX reference built from lax.conv_general_dilated (independent of
    # the im2col path), NCHW throughout.
    def reference(self, x, medium_array):
        for i in range(3):
            a = medium_array[2 - i]
            x = jnp.concatenate((x, a), axis=1)
            prm = self.params[i]
            y = _ref_conv_transpose_nchw(x, prm['wt'], prm['s'], prm['p'],
                                         prm['op'])
            y = y + prm['b'].reshape(1, -1, 1, 1)
            m = y.mean(axis=(0, 2, 3), keepdims=True)
            v = ((y - m) ** 2).mean(axis=(0, 2, 3), keepdims=True)
            yn = (y - m) / jnp.sqrt(v + _BN_EPS)
            yb = (prm['gamma'].reshape(1, -1, 1, 1) * yn
                  + prm['beta'].reshape(1, -1, 1, 1))
            al = prm['alpha'][0]
            x = jnp.where(yb >= 0, yb, al * yb)
        return x


# --------------------------------- main ------------------------------------ #
if __name__ == "__main__":
    key = jax.random.PRNGKey(0)

    # layer configs: ((cin, cout), kernel, stride, padding)
    layers = [
        ((8, 8), 4, 2, 1),    # i=0: 4ch x + 4ch skip -> 8ch, upsample x2
        ((12, 8), 4, 2, 1),   # i=1: 8ch x + 4ch skip -> 8ch, output_padding=(1,0)
        ((12, 4), 3, 1, 1),   # i=2: 8ch x + 4ch skip -> 4ch, same spatial
    ]

    key, kp = jax.random.split(key)
    dec = DecoderPallas(layers, kp, is_excitation=False)

    key, kx, k0, k1, k2 = jax.random.split(key, 5)
    x = jax.random.normal(kx, (2, 4, 4, 4), jnp.float32)
    medium_array = [
        jax.random.normal(k0, (2, 4, 17, 16), jnp.float32),  # used at i=2
        jax.random.normal(k1, (2, 4, 8, 8), jnp.float32),    # used at i=1
        jax.random.normal(k2, (2, 4, 4, 4), jnp.float32),    # used at i=0
    ]

    fwd = jax.jit(lambda x_, m0, m1, m2: dec(x_, [m0, m1, m2]))
    out = jax.block_until_ready(fwd(x, *medium_array))

    ref = dec.reference(x, medium_array)
    assert out.shape == (2, 4, 17, 16), out.shape
    err = float(jnp.max(jnp.abs(out - ref)))
    assert jnp.allclose(out, ref, atol=2e-4, rtol=2e-4), f"mismatch {err}"

    print("KERNEL_OK")
</pallas_src>

<mosaic_0001>
module attributes {stable_mosaic.version = 11 : i64} {
  func.func @_fused_layer_kernel(%arg0: memref<8x128xf32, #tpu.memory_space<vmem>>, %arg1: memref<128x128xf32, #tpu.memory_space<vmem>>, %arg2: memref<8x1xf32, #tpu.memory_space<vmem>>, %arg3: memref<8x1xf32, #tpu.memory_space<vmem>>, %arg4: memref<8x1xf32, #tpu.memory_space<vmem>>, %arg5: memref<1xf32, #tpu.memory_space<smem>>, %arg6: memref<8x128xf32, #tpu.memory_space<vmem>>) attributes {dimension_semantics = [], scalar_prefetch = 0 : i64, scratch_operands = 0 : i64, tpu.core_type = #tpu.core_type<tc>} {
    %c0 = arith.constant 0 : index
    %c0_0 = arith.constant 0 : index
    %0 = vector.load %arg0[%c0, %c0_0] : memref<8x128xf32, #tpu.memory_space<vmem>>, vector<8x128xf32>
    %c0_1 = arith.constant 0 : index
    %c0_2 = arith.constant 0 : index
    %1 = vector.load %arg1[%c0_1, %c0_2] : memref<128x128xf32, #tpu.memory_space<vmem>>, vector<128x128xf32>
    %cst = arith.constant dense<0.000000e+00> : vector<8x128xf32>
    %2 = tpu.matmul %0, %1, %cst {dimension_numbers = #tpu.dot_dimension_numbers<[1], [0], [0], [1], [0, 0, 1, 1], [], []>} : vector<8x128xf32>, vector<128x128xf32>, vector<8x128xf32> -> vector<8x128xf32>
    %c0_3 = arith.constant 0 : index
    %c0_4 = arith.constant 0 : index
    %3 = vector.load %arg2[%c0_3, %c0_4] : memref<8x1xf32, #tpu.memory_space<vmem>>, vector<8x1xf32>
    %4 = vector.broadcast %3 : vector<8x1xf32> to vector<8x128xf32>
    %5 = arith.addf %2, %4 : vector<8x128xf32>
    %cst_5 = arith.constant dense<0.000000e+00> : vector<8xf32>
    %6 = vector.multi_reduction <add>, %5, %cst_5 [1] : vector<8x128xf32> to vector<8xf32>
    %7 = vector.shape_cast %6 : vector<8xf32> to vector<8x1xf32>
    %cst_6 = arith.constant 7.812500e-03 : f32
    %8 = vector.broadcast %cst_6 : f32 to vector<8x1xf32>
    %9 = arith.mulf %7, %8 : vector<8x1xf32>
    %10 = vector.broadcast %9 : vector<8x1xf32> to vector<8x128xf32>
    %11 = arith.subf %5, %10 : vector<8x128xf32>
    %12 = arith.mulf %11, %11 : vector<8x128xf32>
    %cst_7 = arith.constant dense<0.000000e+00> : vector<8xf32>
    %13 = vector.multi_reduction <add>, %12, %cst_7 [1] : vector<8x128xf32> to vector<8xf32>
    %14 = vector.shape_cast %13 : vector<8xf32> to vector<8x1xf32>
    %cst_8 = arith.constant 7.812500e-03 : f32
    %15 = vector.broadcast %cst_8 : f32 to vector<8x1xf32>
    %16 = arith.mulf %14, %15 : vector<8x1xf32>
    %cst_9 = arith.constant 9.99999974E-6 : f32
    %17 = vector.broadcast %cst_9 : f32 to vector<8x1xf32>
    %18 = arith.addf %16, %17 : vector<8x1xf32>
    %19 = math.rsqrt %18 : vector<8x1xf32>
    %20 = vector.broadcast %19 : vector<8x1xf32> to vector<8x128xf32>
    %21 = arith.mulf %11, %20 : vector<8x128xf32>
    %c0_10 = arith.constant 0 : index
    %c0_11 = arith.constant 0 : index
    %22 = vector.load %arg3[%c0_10, %c0_11] : memref<8x1xf32, #tpu.memory_space<vmem>>, vector<8x1xf32>
    %23 = vector.broadcast %22 : vector<8x1xf32> to vector<8x128xf32>
    %24 = arith.mulf %23, %21 : vector<8x128xf32>
    %c0_12 = arith.constant 0 : index
    %c0_13 = arith.constant 0 : index
    %25 = vector.load %arg4[%c0_12, %c0_13] : memref<8x1xf32, #tpu.memory_space<vmem>>, vector<8x1xf32>
    %26 = vector.broadcast %25 : vector<8x1xf32> to vector<8x128xf32>
    %27 = arith.addf %24, %26 : vector<8x128xf32>
    %c0_14 = arith.constant 0 : index
    %28 = memref.load %arg5[%c0_14] : memref<1xf32, #tpu.memory_space<smem>>
    %cst_15 = arith.constant 0.000000e+00 : f32
    %29 = vector.broadcast %cst_15 : f32 to vector<8x128xf32>
    %30 = arith.cmpf oge, %27, %29 : vector<8x128xf32>
    %31 = vector.broadcast %28 : f32 to vector<8x128xf32>
    %32 = arith.mulf %31, %27 : vector<8x128xf32>
    %33 = arith.select %30, %27, %32 : vector<8x128xi1>, vector<8x128xf32>
    %c0_16 = arith.constant 0 : index
    %c0_17 = arith.constant 0 : index
    %34 = vector.load %arg6[%c0_16, %c0_17] : memref<8x128xf32, #tpu.memory_space<vmem>>, vector<8x128xf32>
    tpu.vector_store %arg6[%c0_16, %c0_17], %33 {strides = array<i32>} : memref<8x128xf32, #tpu.memory_space<vmem>>, vector<8x128xf32>,
    return
  }
}

module attributes {stable_mosaic.version = 11 : i64} {
  func.func @_fused_layer_kernel(%arg0: memref<8x192xf32, #tpu.memory_space<vmem>>, %arg1: memref<192x544xf32, #tpu.memory_space<vmem>>, %arg2: memref<8x1xf32, #tpu.memory_space<vmem>>, %arg3: memref<8x1xf32, #tpu.memory_space<vmem>>, %arg4: memref<8x1xf32, #tpu.memory_space<vmem>>, %arg5: memref<1xf32, #tpu.memory_space<smem>>, %arg6: memref<8x544xf32, #tpu.memory_space<vmem>>) attributes {dimension_semantics = [], scalar_prefetch = 0 : i64, scratch_operands = 0 : i64, tpu.core_type = #tpu.core_type<tc>} {
    %c0 = arith.constant 0 : index
    %c0_0 = arith.constant 0 : index
    %0 = vector.load %arg0[%c0, %c0_0] : memref<8x192xf32, #tpu.memory_space<vmem>>, vector<8x192xf32>
    %c0_1 = arith.constant 0 : index
    %c0_2 = arith.constant 0 : index
    %1 = vector.load %arg1[%c0_1, %c0_2] : memref<192x544xf32, #tpu.memory_space<vmem>>, vector<192x544xf32>
    %cst = arith.constant dense<0.000000e+00> : vector<8x544xf32>
    %2 = tpu.matmul %0, %1, %cst {dimension_numbers = #tpu.dot_dimension_numbers<[1], [0], [0], [1], [0, 0, 1, 1], [], []>} : vector<8x192xf32>, vector<192x544xf32>, vector<8x544xf32> -> vector<8x544xf32>
    %c0_3 = arith.constant 0 : index
    %c0_4 = arith.constant 0 : index
    %3 = vector.load %arg2[%c0_3, %c0_4] : memref<8x1xf32, #tpu.memory_space<vmem>>, vector<8x1xf32>
    %4 = vector.broadcast %3 : vector<8x1xf32> to vector<8x544xf32>
    %5 = arith.addf %2, %4 : vector<8x544xf32>
    %cst_5 = arith.constant dense<0.000000e+00> : vector<8xf32>
    %6 = vector.multi_reduction <add>, %5, %cst_5 [1] : vector<8x544xf32> to vector<8xf32>
    %7 = vector.shape_cast %6 : vector<8xf32> to vector<8x1xf32>
    %cst_6 = arith.constant 0.0018382353 : f32
    %8 = vector.broadcast %cst_6 : f32 to vector<8x1xf32>
    %9 = arith.mulf %7, %8 : vector<8x1xf32>
    %10 = vector.broadcast %9 : vector<8x1xf32> to vector<8x544xf32>
    %11 = arith.subf %5, %10 : vector<8x544xf32>
    %12 = arith.mulf %11, %11 : vector<8x544xf32>
    %cst_7 = arith.constant dense<0.000000e+00> : vector<8xf32>
    %13 = vector.multi_reduction <add>, %12, %cst_7 [1] : vector<8x544xf32> to vector<8xf32>
    %14 = vector.shape_cast %13 : vector<8xf32> to vector<8x1xf32>
    %cst_8 = arith.constant 0.0018382353 : f32
    %15 = vector.broadcast %cst_8 : f32 to vector<8x1xf32>
    %16 = arith.mulf %14, %15 : vector<8x1xf32>
    %cst_9 = arith.constant 9.99999974E-6 : f32
    %17 = vector.broadcast %cst_9 : f32 to vector<8x1xf32>
    %18 = arith.addf %16, %17 : vector<8x1xf32>
    %19 = math.rsqrt %18 : vector<8x1xf32>
    %20 = vector.broadcast %19 : vector<8x1xf32> to vector<8x544xf32>
    %21 = arith.mulf %11, %20 : vector<8x544xf32>
    %c0_10 = arith.constant 0 : index
    %c0_11 = arith.constant 0 : index
    %22 = vector.load %arg3[%c0_10, %c0_11] : memref<8x1xf32, #tpu.memory_space<vmem>>, vector<8x1xf32>
    %23 = vector.broadcast %22 : vector<8x1xf32> to vector<8x544xf32>
    %24 = arith.mulf %23, %21 : vector<8x544xf32>
    %c0_12 = arith.constant 0 : index
    %c0_13 = arith.constant 0 : index
    %25 = vector.load %arg4[%c0_12, %c0_13] : memref<8x1xf32, #tpu.memory_space<vmem>>, vector<8x1xf32>
    %26 = vector.broadcast %25 : vector<8x1xf32> to vector<8x544xf32>
    %27 = arith.addf %24, %26 : vector<8x544xf32>
    %c0_14 = arith.constant 0 : index
    %28 = memref.load %arg5[%c0_14] : memref<1xf32, #tpu.memory_space<smem>>
    %cst_15 = arith.constant 0.000000e+00 : f32
    %29 = vector.broadcast %cst_15 : f32 to vector<8x544xf32>
    %30 = arith.cmpf oge, %27, %29 : vector<8x544xf32>
    %31 = vector.broadcast %28 : f32 to vector<8x544xf32>
    %32 = arith.mulf %31, %27 : vector<8x544xf32>
    %33 = arith.select %30, %27, %32 : vector<8x544xi1>, vector<8x544xf32>
    %c0_16 = arith.constant 0 : index
    %c0_17 = arith.constant 0 : index
    %34 = vector.load %arg6[%c0_16, %c0_17] : memref<8x544xf32, #tpu.memory_space<vmem>>, vector<8x544xf32>
    tpu.vector_store %arg6[%c0_16, %c0_17], %33 {strides = array<i32>} : memref<8x544xf32, #tpu.memory_space<vmem>>, vector<8x544xf32>,
    return
  }
}

module attributes {stable_mosaic.version = 11 : i64} {
  func.func @_fused_layer_kernel(%arg0: memref<4x108xf32, #tpu.memory_space<vmem>>, %arg1: memref<108x544xf32, #tpu.memory_space<vmem>>, %arg2: memref<4x1xf32, #tpu.memory_space<vmem>>, %arg3: memref<4x1xf32, #tpu.memory_space<vmem>>, %arg4: memref<4x1xf32, #tpu.memory_space<vmem>>, %arg5: memref<1xf32, #tpu.memory_space<smem>>, %arg6: memref<4x544xf32, #tpu.memory_space<vmem>>) attributes {dimension_semantics = [], scalar_prefetch = 0 : i64, scratch_operands = 0 : i64, tpu.core_type = #tpu.core_type<tc>} {
    %c0 = arith.constant 0 : index
    %c0_0 = arith.constant 0 : index
    %0 = vector.load %arg0[%c0, %c0_0] : memref<4x108xf32, #tpu.memory_space<vmem>>, vector<4x108xf32>
    %c0_1 = arith.constant 0 : index
    %c0_2 = arith.constant 0 : index
    %1 = vector.load %arg1[%c0_1, %c0_2] : memref<108x544xf32, #tpu.memory_space<vmem>>, vector<108x544xf32>
    %cst = arith.constant dense<0.000000e+00> : vector<4x544xf32>
    %2 = tpu.matmul %0, %1, %cst {dimension_numbers = #tpu.dot_dimension_numbers<[1], [0], [0], [1], [0, 0, 1, 1], [], []>} : vector<4x108xf32>, vector<108x544xf32>, vector<4x544xf32> -> vector<4x544xf32>
    %c0_3 = arith.constant 0 : index
    %c0_4 = arith.constant 0 : index
    %3 = vector.load %arg2[%c0_3, %c0_4] : memref<4x1xf32, #tpu.memory_space<vmem>>, vector<4x1xf32>
    %4 = vector.broadcast %3 : vector<4x1xf32> to vector<4x544xf32>
    %5 = arith.addf %2, %4 : vector<4x544xf32>
    %cst_5 = arith.constant dense<0.000000e+00> : vector<4xf32>
    %6 = vector.multi_reduction <add>, %5, %cst_5 [1] : vector<4x544xf32> to vector<4xf32>
    %7 = vector.shape_cast %6 : vector<4xf32> to vector<4x1xf32>
    %cst_6 = arith.constant 0.0018382353 : f32
    %8 = vector.broadcast %cst_6 : f32 to vector<4x1xf32>
    %9 = arith.mulf %7, %8 : vector<4x1xf32>
    %10 = vector.broadcast %9 : vector<4x1xf32> to vector<4x544xf32>
    %11 = arith.subf %5, %10 : vector<4x544xf32>
    %12 = arith.mulf %11, %11 : vector<4x544xf32>
    %cst_7 = arith.constant dense<0.000000e+00> : vector<4xf32>
    %13 = vector.multi_reduction <add>, %12, %cst_7 [1] : vector<4x544xf32> to vector<4xf32>
    %14 = vector.shape_cast %13 : vector<4xf32> to vector<4x1xf32>
    %cst_8 = arith.constant 0.0018382353 : f32
    %15 = vector.broadcast %cst_8 : f32 to vector<4x1xf32>
    %16 = arith.mulf %14, %15 : vector<4x1xf32>
    %cst_9 = arith.constant 9.99999974E-6 : f32
    %17 = vector.broadcast %cst_9 : f32 to vector<4x1xf32>
    %18 = arith.addf %16, %17 : vector<4x1xf32>
    %19 = math.rsqrt %18 : vector<4x1xf32>
    %20 = vector.broadcast %19 : vector<4x1xf32> to vector<4x544xf32>
    %21 = arith.mulf %11, %20 : vector<4x544xf32>
    %c0_10 = arith.constant 0 : index
    %c0_11 = arith.constant 0 : index
    %22 = vector.load %arg3[%c0_10, %c0_11] : memref<4x1xf32, #tpu.memory_space<vmem>>, vector<4x1xf32>
    %23 = vector.broadcast %22 : vector<4x1xf32> to vector<4x544xf32>
    %24 = arith.mulf %23, %21 : vector<4x544xf32>
    %c0_12 = arith.constant 0 : index
    %c0_13 = arith.constant 0 : index
    %25 = vector.load %arg4[%c0_12, %c0_13] : memref<4x1xf32, #tpu.memory_space<vmem>>, vector<4x1xf32>
    %26 = vector.broadcast %25 : vector<4x1xf32> to vector<4x544xf32>
    %27 = arith.addf %24, %26 : vector<4x544xf32>
    %c0_14 = arith.constant 0 : index
    %28 = memref.load %arg5[%c0_14] : memref<1xf32, #tpu.memory_space<smem>>
    %cst_15 = arith.constant 0.000000e+00 : f32
    %29 = vector.broadcast %cst_15 : f32 to vector<4x544xf32>
    %30 = arith.cmpf oge, %27, %29 : vector<4x544xf32>
    %31 = vector.broadcast %28 : f32 to vector<4x544xf32>
    %32 = arith.mulf %31, %27 : vector<4x544xf32>
    %33 = arith.select %30, %27, %32 : vector<4x544xi1>, vector<4x544xf32>
    %c0_16 = arith.constant 0 : index
    %c0_17 = arith.constant 0 : index
    %34 = vector.load %arg6[%c0_16, %c0_17] : memref<4x544xf32, #tpu.memory_space<vmem>>, vector<4x544xf32>
    tpu.vector_store %arg6[%c0_16, %c0_17], %33 {strides = array<i32>} : memref<4x544xf32, #tpu.memory_space<vmem>>, vector<4x544xf32>,
    return
  }
}

</mosaic_0001>

<bundles_post_ra>
// kernel: _lambda_.3
= control target key start
LH: loop header
LB: loop body
LE: loop exit
PB: predicated region body
PF: predicated region fallthrough
CT: control target
= control target key end

     0   :  { %v236_v0 = vmov 0.0|0.0   ;;  %vm237_vm0 = vmmov 0   ;;  %v238_v4 = vmov 0.0   ;;  %v239_v7 = vmov 0   ;;  %s341_s1 = inlined_call_operand.vmem [shape: f32[128,128], index: 1, kind: input, shape index: {}]   ;;  %s342_s2 = inlined_call_operand.vmem [shape: f32[8,1], index: 2, kind: input, shape index: {}]   ;;  %s343_s0 = inlined_call_operand.vmem [shape: f32[8,128], index: 0, kind: input, shape index: {}]   ;;  %s344_s3 = inlined_call_operand.vmem [shape: f32[8,1], index: 3, kind: input, shape index: {}]   ;;  %s345_s4 = inlined_call_operand.vmem [shape: f32[8,1], index: 4, kind: input, shape index: {}]   ;;  %s346_s5 = inlined_call_operand.<no memory space> [shape: f32[1], index: 5, kind: input, shape index: {}]   ;;  %s347_s6 = inlined_call_operand.vmem [shape: f32[8,128], index: 6, kind: output, shape index: {}]  }
   0x1   :  { %204 = vmatprep.subr.bf16.mxu0 %v236_v0  ;;  %v25_v1 = vld [vmem:[%s341_s1] sm:$0xff]  ;;  %v26_v2 = vld [vmem:[%s341_s1 + $0x8] sm:$0xff]  ;;  %v27_v3 = vld [vmem:[%s341_s1 + $0x10] sm:$0xff]  ;;  %201 = vmatprep.mubr.msk.f32.mxu0 %vm237_vm0, %v238_v4  ;;  %v144_v46 = vstv %s346_s5 }
   0x2   :  { %v205_v5 = vpack.c.bf16 %v26_v2, %v25_v1  ;;  %v28_v6 = vld [vmem:[%s341_s1 + $0x18] sm:$0xff]  ;;  %232 = vset.pattern.permute.xlu0 %v239_v7  ;;  %233 = vset.pattern.permute.xlu1 %v239_v7  ;;  %v29_v9 = vld [vmem:[%s341_s1 + $0x20] sm:$0xff]  ;;  %v30_v10 = vld [vmem:[%s341_s1 + $0x28] sm:$0xff] }
   0x3   :  { %v208_v8 = vpack.c.bf16 %v28_v6, %v27_v3  ;;  %v41_v11 = vld [vmem:[%s342_s2] sm:$0xff]  ;;  %v211_v12 = vpack.c.bf16 %v30_v10, %v29_v9  ;;  %v31_v13 = vld [vmem:[%s341_s1 + $0x30] sm:$0xff]  ;;  %v32_v14 = vld [vmem:[%s341_s1 + $0x38] sm:$0xff] }
   0x4   :  { %206 = vmatpush3.bf16.msra.mxu0 %v205_v5  ;;  %44 = vperm.xlu0 %232, %v41_v11   ;;  %v214_v15 = vpack.c.bf16 %v32_v14, %v31_v13  ;;  %v33_v16 = vld [vmem:[%s341_s1 + $0x40] sm:$0xff]  ;;  %v34_v17 = vld [vmem:[%s341_s1 + $0x48] sm:$0xff]  ;;  %v35_v19 = vld [vmem:[%s341_s1 + $0x50] sm:$0xff] }
   0x5   :  { %207 = vmatprep.subr.bf16.mxu0 %v236_v0  ;;  %v217_v18 = vpack.c.bf16 %v34_v17, %v33_v16  ;;  %v36_v20 = vld [vmem:[%s341_s1 + $0x58] sm:$0xff]  ;;  %v37_v22 = vld [vmem:[%s341_s1 + $0x60] sm:$0xff]  ;;  %v38_v23 = vld [vmem:[%s341_s1 + $0x68] sm:$0xff] }
   0x6   :  { %v220_v21 = vpack.c.bf16 %v36_v20, %v35_v19  ;;  %v223_v24 = vpack.c.bf16 %v38_v23, %v37_v22  ;;  %v39_v25 = vld [vmem:[%s341_s1 + $0x70] sm:$0xff]  ;;  %v40_v26 = vld [vmem:[%s341_s1 + $0x78] sm:$0xff]  ;;  %v24_v28 = vld [vmem:[%s343_s0] sm:$0xff] }
   0x7   :  { %v226_v27 = vpack.c.bf16 %v40_v26, %v39_v25  ;;  %v128_v29 = vld [vmem:[%s344_s3] sm:$0xff] }
   0x8   :  { %209 = vmatpush3.bf16.msra.mxu0 %v208_v8  ;;  %131 = vperm.xlu1 %233, %v128_v29   ;;  %v135_v38 = vld [vmem:[%s345_s4] sm:$0xff] }
   0x9   :  { %210 = vmatprep.subr.bf16.mxu0 %v236_v0 }
   0xc   :  { %212 = vmatpush3.bf16.msra.mxu0 %v211_v12 }
   0xd   :  { %213 = vmatprep.subr.bf16.mxu0 %v236_v0 }
  0x10   :  { %215 = vmatpush3.bf16.msra.mxu0 %v214_v15 }
  0x11   :  { %216 = vmatprep.subr.bf16.mxu0 %v236_v0 }
  0x14   :  { %218 = vmatpush3.bf16.msra.mxu0 %v217_v18 }
  0x15   :  { %219 = vmatprep.subr.bf16.mxu0 %v236_v0 }
  0x18   :  { %221 = vmatpush3.bf16.msra.mxu0 %v220_v21 }
  0x19   :  { %222 = vmatprep.subr.bf16.mxu0 %v236_v0 }
  0x1c   :  { %224 = vmatpush3.bf16.msra.mxu0 %v223_v24 }
  0x1d   :  { %225 = vmatprep.subr.bf16.mxu0 %v236_v0 }
  0x20   :  { %227 = vmatpush3.bf16.msra.mxu0 %v226_v27 }
  0x23   :  { %202 = vmatmul.mubr.f32.vlgmr.msra.gmra.mrb[0].mxu0 %v24_v28 }
  0x83   :  { %v45_v30 = vpop.permute.xlu0 %44 }
  0x87   :  { %v132_v39 = vpop.permute.xlu1 %131 }
  0xf6   :  { %v113_v31 = vpop.f32.mrb[0].mxu0 }
  0xf7   :  { %v114_v32 = vadd.f32 %v113_v31, %v45_v30  ;;  %v203_v33 = vpop.f32.mrb[1].mxu0 }
  0xf9   :  { %117 = vadd.xlane.f32.xlu0 %v114_v32 }
 0x186   :  { %v118_v34 = vpop.xlane.xlu0 %117 }
 0x187   :  { %v119_v35 = vmul.f32 0.0078125, %v118_v34 }
 0x189   :  { %v120_v36 = vsub.f32 %v114_v32, %v119_v35 }
 0x18b   :  { %v121_v37 = vmul.f32 %v120_v36, %v120_v36 }
 0x18d   :  { %122 = vadd.xlane.f32.xlu1 %v121_v37 }
 0x19e   :  { %138 = vperm.xlu1 %233, %v135_v38  }
 0x21a   :  { %v123_v40 = vpop.xlane.xlu1 %122 }
 0x21b   :  { %v124_v41 = vmul.f32 0.0078125, %v123_v40 }
 0x21d   :  { %v125_v42 = vadd.f32 1e-05, %v124_v41 }
 0x21e   :  { %v139_v47 = vpop.permute.xlu1 %138 }
 0x21f   :  { %234 = vrsqrt.f32 %v125_v42 }
 0x229   :  { %v235_v43 = vpop.eup %234 }
 0x22a   :  { %v127_v44 = vmul.f32 %v235_v43, %v120_v36 }
 0x22c   :  { %v134_v45 = vmul.f32 %v132_v39, %v127_v44 }
 0x22e   :  { %v141_v48 = vadd.f32 %v139_v47, %v134_v45 }
 0x230   :  { %vm143_vm1 = vcmp.ge.f32.partialorder %v141_v48, 0.0  ;;  %v145_v49 = vmul.f32 %v144_v46, %v141_v48 }
 0x232   :  { %v146_v50 = vsel %vm143_vm1, %v141_v48, %v145_v49 }
 0x233   :  { %147 = vst [vmem:[%s347_s6] sm:$0xff] %v146_v50 }

// kernel: _lambda_.4
= control target key start
LH: loop header
LB: loop body
LE: loop exit
PB: predicated region body
PF: predicated region fallthrough
CT: control target
= control target key end

     0   :  { %v591_v3 = vmov 0   ;;  %vm152_vm0 = vcmask 523264   ;;  %vm371_vm1 = vcmask 261120   ;;  %s1037_s1 = inlined_call_operand.vmem [shape: f32[192,544], index: 1, kind: input, shape index: {}]   ;;  %s1038_s0 = inlined_call_operand.vmem [shape: f32[8,192], index: 0, kind: input, shape index: {}]   ;;  %s1039_s2 = inlined_call_operand.vmem [shape: f32[8,1], index: 2, kind: input, shape index: {}]   ;;  %s1040_s3 = inlined_call_operand.vmem [shape: f32[8,1], index: 3, kind: input, shape index: {}]   ;;  %s1041_s4 = inlined_call_operand.vmem [shape: f32[8,1], index: 4, kind: input, shape index: {}]   ;;  %s1042_s5 = inlined_call_operand.<no memory space> [shape: f32[1], index: 5, kind: input, shape index: {}]   ;;  %s1043_s6 = inlined_call_operand.vmem [shape: f32[8,544], index: 6, kind: output, shape index: {}]  }
   0x1   :  { %v27_v0 = vld [vmem:[%s1037_s1 + $0x8] sm:$0xff]  ;;  %v32_v1 = vld [vmem:[%s1037_s1 + $0x30] sm:$0xff]  ;;  %v26_v2 = vld [vmem:[%s1037_s1] sm:$0xff]  ;;  %587 = vset.pattern.permute.xlu0 %v591_v3  ;;  %588 = vset.pattern.permute.xlu1 %v591_v3 }
   0x2   :  { %v453_v4 = vpack.c.bf16 %v32_v1, %v27_v0  ;;  %v31_v5 = vld [vmem:[%s1037_s1 + $0x28] sm:$0xff]  ;;  %v29_v6 = vld [vmem:[%s1037_s1 + $0x18] sm:$0xff]  ;;  %v34_v7 = vld [vmem:[%s1037_s1 + $0x40] sm:$0xff] }
   0x3   :  { %v455_v8 = vpack.c.bf16 %v31_v5, %v26_v2  ;;  %v501_v9 = vpack.c.bf16 %v34_v7, %v29_v6  ;;  %v37_v10 = vld [vmem:[%s1037_s1 + $0x58] sm:$0xff]  ;;  %v42_v11 = vld [vmem:[%s1037_s1 + $0x80] sm:$0xff]  ;;  %v28_v12 = vld [vmem:[%s1037_s1 + $0x10] sm:$0xff] }
   0x4   :  { %454 = vmatprep.subr.bf16.mxu0 %v453_v4  ;;  %v457_v13 = vpack.c.bf16 %v42_v11, %v37_v10  ;;  %v33_v14 = vld [vmem:[%s1037_s1 + $0x38] sm:$0xff]  ;;  %v36_v15 = vld [vmem:[%s1037_s1 + $0x50] sm:$0xff]  ;;  %v39_v19 = vld [vmem:[%s1037_s1 + $0x68] sm:$0xff] }
   0x5   :  { %v41_v16 = vld [vmem:[%s1037_s1 + $0x78] sm:$0xff]  ;;  %456 = vmatpush1.bf16.msra.mxu0 %v455_v8  ;;  %502 = vmatprep.subr.bf16.mxu1 %v501_v9  ;;  %v503_v17 = vpack.c.bf16 %v33_v14, %v28_v12  ;;  %v44_v20 = vld [vmem:[%s1037_s1 + $0x90] sm:$0xff]  ;;  %v47_v21 = vld [vmem:[%s1037_s1 + $0xa8] sm:$0xff] }
   0x6   :  { %v459_v18 = vpack.c.bf16 %v41_v16, %v36_v15  ;;  %458 = vmatprep.subr.bf16.mxu0 %v457_v13  ;;  %v505_v22 = vpack.c.bf16 %v44_v20, %v39_v19  ;;  %v52_v23 = vld [vmem:[%s1037_s1 + $0xd0] sm:$0xff]  ;;  %v38_v24 = vld [vmem:[%s1037_s1 + $0x60] sm:$0xff]  ;;  %v43_v25 = vld [vmem:[%s1037_s1 + $0x88] sm:$0xff] }
   0x7   :  { %504 = vmatpush1.bf16.msra.mxu1 %v503_v17  ;;  %v461_v26 = vpack.c.bf16 %v52_v23, %v47_v21  ;;  %v507_v27 = vpack.c.bf16 %v43_v25, %v38_v24  ;;  %v46_v28 = vld [vmem:[%s1037_s1 + $0xa0] sm:$0xff]  ;;  %v51_v29 = vld [vmem:[%s1037_s1 + $0xc8] sm:$0xff]  ;;  %v49_v30 = vld [vmem:[%s1037_s1 + $0xb8] sm:$0xff] }
   0x8   :  { %506 = vmatprep.subr.bf16.mxu1 %v505_v22  ;;  %v54_v31 = vld [vmem:[%s1037_s1 + $0xe0] sm:$0xff]  ;;  %v57_v32 = vld [vmem:[%s1037_s1 + $0xf8] sm:$0xff]  ;;  %v463_v34 = vpack.c.bf16 %v51_v29, %v46_v28  ;;  %v48_v36 = vld [vmem:[%s1037_s1 + $0xb0] sm:$0xff] }
   0x9   :  { %v62_v33 = vld [vmem:[%s1037_s1 + $0x120] sm:$0xff]  ;;  %460 = vmatpush1.bf16.msra.mxu0 %v459_v18  ;;  %v509_v35 = vpack.c.bf16 %v54_v31, %v49_v30  ;;  %v53_v37 = vld [vmem:[%s1037_s1 + $0xd8] sm:$0xff]  ;;  %v56_v38 = vld [vmem:[%s1037_s1 + $0xf0] sm:$0xff] }
   0xa   :  { %462 = vmatprep.subr.bf16.mxu0 %v461_v26  ;;  %v465_v39 = vpack.c.bf16 %v62_v33, %v57_v32  ;;  %v61_v40 = vld [vmem:[%s1037_s1 + $0x118] sm:$0xff]  ;;  %v59_v41 = vld [vmem:[%s1037_s1 + $0x108] sm:$0xff]  ;;  %v64_v42 = vld [vmem:[%s1037_s1 + $0x130] sm:$0xff]  ;;  %v511_v43 = vpack.c.bf16 %v53_v37, %v48_v36 }
   0xb   :  { %508 = vmatpush1.bf16.msra.mxu1 %v507_v27  ;;  %v67_v44 = vld [vmem:[%s1037_s1 + $0x148] sm:$0xff]  ;;  %v72_v45 = vld [vmem:[%s1037_s1 + $0x170] sm:$0xff]  ;;  %v513_v46 = vpack.c.bf16 %v64_v42, %v59_v41  ;;  %v58_v47 = vld [vmem:[%s1037_s1 + $0x100] sm:$0xff]  ;;  %v467_v49 = vpack.c.bf16 %v61_v40, %v56_v38 }
   0xc   :  { %510 = vmatprep.subr.bf16.mxu1 %v509_v35  ;;  %v63_v48 = vld [vmem:[%s1037_s1 + $0x128] sm:$0xff]  ;;  %v69_v50 = vld [vmem:[%s1037_s1 + $0x158] sm:$0xff]  ;;  %v74_v51 = vld [vmem:[%s1037_s1 + $0x180] sm:$0xff]  ;;  %v469_v52 = vpack.c.bf16 %v72_v45, %v67_v44 }
   0xd   :  { %464 = vmatpush1.bf16.msra.mxu0 %v463_v34  ;;  %v66_v53 = vld [vmem:[%s1037_s1 + $0x140] sm:$0xff]  ;;  %v71_v54 = vld [vmem:[%s1037_s1 + $0x168] sm:$0xff]  ;;  %v515_v55 = vpack.c.bf16 %v63_v48, %v58_v47  ;;  %v77_v56 = vld [vmem:[%s1037_s1 + $0x198] sm:$0xff]  ;;  %v517_v58 = vpack.c.bf16 %v74_v51, %v69_v50 }
   0xe   :  { %466 = vmatprep.subr.bf16.mxu0 %v465_v39  ;;  %v82_v57 = vld [vmem:[%s1037_s1 + $0x1c0] sm:$0xff]  ;;  %v68_v59 = vld [vmem:[%s1037_s1 + $0x150] sm:$0xff]  ;;  %v73_v60 = vld [vmem:[%s1037_s1 + $0x178] sm:$0xff]  ;;  %v471_v61 = vpack.c.bf16 %v71_v54, %v66_v53 }
   0xf   :  { %512 = vmatpush1.bf16.msra.mxu1 %v511_v43  ;;  %v79_v62 = vld [vmem:[%s1037_s1 + $0x1a8] sm:$0xff]  ;;  %v84_v63 = vld [vmem:[%s1037_s1 + $0x1d0] sm:$0xff]  ;;  %v473_v0 = vpack.c.bf16 %v82_v57, %v77_v56  ;;  %v81_v2 = vld [vmem:[%s1037_s1 + $0x1b8] sm:$0xff]  ;;  %v519_v3 = vpack.c.bf16 %v73_v60, %v68_v59 }
  0x10   :  { %514 = vmatprep.subr.bf16.mxu1 %v513_v46  ;;  %v76_v1 = vld [vmem:[%s1037_s1 + $0x190] sm:$0xff]  ;;  %v87_v4 = vld [vmem:[%s1037_s1 + $0x1e8] sm:$0xff]  ;;  %v521_v6 = vpack.c.bf16 %v84_v63, %v79_v62  ;;  %v78_v7 = vld [vmem:[%s1037_s1 + $0x1a0] sm:$0xff] }
  0x11   :  { %468 = vmatpush1.bf16.msra.mxu0 %v467_v49  ;;  %v92_v5 = vld [vmem:[%s1037_s1 + $0x210] sm:$0xff]  ;;  %v83_v8 = vld [vmem:[%s1037_s1 + $0x1c8] sm:$0xff]  ;;  %v475_v9 = vpack.c.bf16 %v81_v2, %v76_v1  ;;  %v89_v10 = vld [vmem:[%s1037_s1 + $0x1f8] sm:$0xff] }
  0x12   :  { %470 = vmatprep.subr.bf16.mxu0 %v469_v52  ;;  %v94_v11 = vld [vmem:[%s1037_s1 + $0x220] sm:$0xff]  ;;  %v477_v12 = vpack.c.bf16 %v92_v5, %v87_v4  ;;  %v91_v14 = vld [vmem:[%s1037_s1 + $0x208] sm:$0xff]  ;;  %v523_v15 = vpack.c.bf16 %v83_v8, %v78_v7  ;;  %v97_v16 = vld [vmem:[%s1037_s1 + $0x238] sm:$0xff] }
  0x13   :  { %516 = vmatpush1.bf16.msra.mxu1 %v515_v55  ;;  %v86_v13 = vld [vmem:[%s1037_s1 + $0x1e0] sm:$0xff]  ;;  %v525_v18 = vpack.c.bf16 %v94_v11, %v89_v10  ;;  %v88_v19 = vld [vmem:[%s1037_s1 + $0x1f0] sm:$0xff]  ;;  %v93_v20 = vld [vmem:[%s1037_s1 + $0x218] sm:$0xff] }
  0x14   :  { %518 = vmatprep.subr.bf16.mxu1 %v517_v58  ;;  %v102_v17 = vld [vmem:[%s1037_s1 + $0x260] sm:$0xff]  ;;  %v479_v21 = vpack.c.bf16 %v91_v14, %v86_v13  ;;  %v99_v22 = vld [vmem:[%s1037_s1 + $0x248] sm:$0xff]  ;;  %v104_v23 = vld [vmem:[%s1037_s1 + $0x270] sm:$0xff]  ;;  %v527_v27 = vpack.c.bf16 %v93_v20, %v88_v19 }
  0x15   :  { %472 = vmatpush1.bf16.msra.mxu0 %v471_v61  ;;  %v481_v24 = vpack.c.bf16 %v102_v17, %v97_v16  ;;  %v96_v25 = vld [vmem:[%s1037_s1 + $0x230] sm:$0xff]  ;;  %v101_v26 = vld [vmem:[%s1037_s1 + $0x258] sm:$0xff]  ;;  %v107_v28 = vld [vmem:[%s1037_s1 + $0x288] sm:$0xff]  ;;  %v529_v30 = vpack.c.bf16 %v104_v23, %v99_v22  ;;  %v592_v23 = vmov 0.0|0.0  }
  0x16   :  { %474 = vmatprep.subr.bf16.mxu0 %v473_v0  ;;  %v112_v29 = vld [vmem:[%s1037_s1 + $0x2b0] sm:$0xff]  ;;  %v98_v31 = vld [vmem:[%s1037_s1 + $0x240] sm:$0xff]  ;;  %v103_v32 = vld [vmem:[%s1037_s1 + $0x268] sm:$0xff]  ;;  %v483_v33 = vpack.c.bf16 %v101_v26, %v96_v25 }
  0x17   :  { %520 = vmatpush1.bf16.msra.mxu1 %v519_v3  ;;  %v109_v34 = vld [vmem:[%s1037_s1 + $0x298] sm:$0xff]  ;;  %v114_v35 = vld [vmem:[%s1037_s1 + $0x2c0] sm:$0xff]  ;;  %v485_v36 = vpack.c.bf16 %v112_v29, %v107_v28  ;;  %v111_v38 = vld [vmem:[%s1037_s1 + $0x2a8] sm:$0xff]  ;;  %v531_v39 = vpack.c.bf16 %v103_v32, %v98_v31 }
  0x18   :  { %522 = vmatprep.subr.bf16.mxu1 %v521_v6  ;;  %v106_v37 = vld [vmem:[%s1037_s1 + $0x280] sm:$0xff]  ;;  %v117_v40 = vld [vmem:[%s1037_s1 + $0x2d8] sm:$0xff]  ;;  %v847_v42 = vld [vmem:[%s1038_s0 + $0x8] sm:$0xff]  ;;  %v533_v43 = vpack.c.bf16 %v114_v35, %v109_v34 }
  0x19   :  { %476 = vmatpush1.bf16.msra.mxu0 %v475_v9  ;;  %v122_v41 = vld [vmem:[%s1037_s1 + $0x300] sm:$0xff]  ;;  %v108_v44 = vld [vmem:[%s1037_s1 + $0x290] sm:$0xff]  ;;  %v113_v45 = vld [vmem:[%s1037_s1 + $0x2b8] sm:$0xff]  ;;  %450 = vmatprep.mubr.msk.f32.mxu0 %vm152_vm0, %v847_v42  ;;  %v487_v46 = vpack.c.bf16 %v111_v38, %v106_v37 }
  0x1a   :  { %478 = vmatprep.subr.bf16.mxu0 %v477_v12  ;;  %v119_v47 = vld [vmem:[%s1037_s1 + $0x2e8] sm:$0xff]  ;;  %v124_v48 = vld [vmem:[%s1037_s1 + $0x310] sm:$0xff]  ;;  %451 = vmatprep.mubr.msk.f32.mxu1 %vm152_vm0, %v847_v42  ;;  %v489_v49 = vpack.c.bf16 %v122_v41, %v117_v40  ;;  %v121_v51 = vld [vmem:[%s1037_s1 + $0x2f8] sm:$0xff]  ;;  %v535_v52 = vpack.c.bf16 %v113_v45, %v108_v44 }
  0x1b   :  { %524 = vmatpush1.bf16.msra.mxu1 %v523_v15  ;;  %v116_v50 = vld [vmem:[%s1037_s1 + $0x2d0] sm:$0xff]  ;;  %v127_v53 = vld [vmem:[%s1037_s1 + $0x328] sm:$0xff]  ;;  %v537_v55 = vpack.c.bf16 %v124_v48, %v119_v47  ;;  %v118_v56 = vld [vmem:[%s1037_s1 + $0x2e0] sm:$0xff] }
  0x1c   :  { %526 = vmatprep.subr.bf16.mxu1 %v525_v18  ;;  %v132_v54 = vld [vmem:[%s1037_s1 + $0x350] sm:$0xff]  ;;  %v123_v57 = vld [vmem:[%s1037_s1 + $0x308] sm:$0xff]  ;;  %v491_v58 = vpack.c.bf16 %v121_v51, %v116_v50  ;;  %v129_v59 = vld [vmem:[%s1037_s1 + $0x338] sm:$0xff] }
  0x1d   :  { %480 = vmatpush1.bf16.msra.mxu0 %v479_v21  ;;  %v134_v60 = vld [vmem:[%s1037_s1 + $0x360] sm:$0xff]  ;;  %v493_v61 = vpack.c.bf16 %v132_v54, %v127_v53  ;;  %v131_v63 = vld [vmem:[%s1037_s1 + $0x348] sm:$0xff]  ;;  %v539_v0 = vpack.c.bf16 %v123_v57, %v118_v56  ;;  %v137_v1 = vld [vmem:[%s1037_s1 + $0x378] sm:$0xff] }
  0x1e   :  { %482 = vmatprep.subr.bf16.mxu0 %v481_v24  ;;  %v126_v62 = vld [vmem:[%s1037_s1 + $0x320] sm:$0xff]  ;;  %v541_v3 = vpack.c.bf16 %v134_v60, %v129_v59  ;;  %v128_v4 = vld [vmem:[%s1037_s1 + $0x330] sm:$0xff]  ;;  %v133_v5 = vld [vmem:[%s1037_s1 + $0x358] sm:$0xff] }
  0x1f   :  { %528 = vmatpush1.bf16.msra.mxu1 %v527_v27  ;;  %v142_v2 = vld [vmem:[%s1037_s1 + $0x3a0] sm:$0xff]  ;;  %v495_v6 = vpack.c.bf16 %v131_v63, %v126_v62  ;;  %v139_v7 = vld [vmem:[%s1037_s1 + $0x388] sm:$0xff]  ;;  %v144_v8 = vld [vmem:[%s1037_s1 + $0x3b0] sm:$0xff]  ;;  %v543_v13 = vpack.c.bf16 %v133_v5, %v128_v4 }
  0x20   :  { %530 = vmatprep.subr.bf16.mxu1 %v529_v30  ;;  %v146_v9 = vld [vmem:[%s1039_s2] sm:$0xff]  ;;  %v497_v10 = vpack.c.bf16 %v142_v2, %v137_v1  ;;  %v136_v11 = vld [vmem:[%s1037_s1 + $0x370] sm:$0xff]  ;;  %v141_v12 = vld [vmem:[%s1037_s1 + $0x398] sm:$0xff]  ;;  %v545_v14 = vpack.c.bf16 %v144_v8, %v139_v7 }
  0x21   :  { %484 = vmatpush1.bf16.msra.mxu0 %v483_v33  ;;  %149 = vperm.xlu0 %587, %v146_v9   ;;  %v138_v15 = vld [vmem:[%s1037_s1 + $0x380] sm:$0xff]  ;;  %v143_v16 = vld [vmem:[%s1037_s1 + $0x3a8] sm:$0xff]  ;;  %v499_v17 = vpack.c.bf16 %v141_v12, %v136_v11  ;;  %v40_v24 = vld [vmem:[%s1037_s1 + $0x70] sm:$0xff] }
  0x22   :  { %486 = vmatprep.subr.bf16.mxu0 %v485_v36  ;;  %v30_v18 = vld [vmem:[%s1037_s1 + $0x20] sm:$0xff]  ;;  %v35_v19 = vld [vmem:[%s1037_s1 + $0x48] sm:$0xff]  ;;  %v547_v20 = vpack.c.bf16 %v143_v16, %v138_v15  ;;  %v45_v25 = vld [vmem:[%s1037_s1 + $0x98] sm:$0xff] }
  0x23   :  { %532 = vmatpush1.bf16.msra.mxu1 %v531_v39  ;;  %v937_v21 = vld [vmem:[%s1038_s0] sm:$0xff]  ;;  %v550_v22 = vpack.c.bf16 %v35_v19, %v30_v18  ;;  %v553_v26 = vpack.c.bf16 %v45_v25, %v40_v24  ;;  %v55_v28 = vld [vmem:[%s1037_s1 + $0xe8] sm:$0xff]  ;;  %v60_v30 = vld [vmem:[%s1037_s1 + $0x110] sm:$0xff] }
  0x24   :  { %534 = vmatprep.subr.bf16.mxu1 %v533_v43  ;;  %v50_v27 = vld [vmem:[%s1037_s1 + $0xc0] sm:$0xff]  ;;  %v65_v31 = vld [vmem:[%s1037_s1 + $0x138] sm:$0xff]  ;;  %v75_v34 = vld [vmem:[%s1037_s1 + $0x188] sm:$0xff] }
  0x25   :  { %488 = vmatpush1.bf16.msra.mxu0 %v487_v46  ;;  %v556_v29 = vpack.c.bf16 %v55_v28, %v50_v27  ;;  %v559_v32 = vpack.c.bf16 %v65_v31, %v60_v30  ;;  %v70_v33 = vld [vmem:[%s1037_s1 + $0x160] sm:$0xff]  ;;  %v80_v36 = vld [vmem:[%s1037_s1 + $0x1b0] sm:$0xff]  ;;  %v85_v37 = vld [vmem:[%s1037_s1 + $0x1d8] sm:$0xff] }
  0x26   :  { %490 = vmatprep.subr.bf16.mxu0 %v489_v49  ;;  %v562_v35 = vpack.c.bf16 %v75_v34, %v70_v33  ;;  %v565_v38 = vpack.c.bf16 %v85_v37, %v80_v36  ;;  %v90_v39 = vld [vmem:[%s1037_s1 + $0x200] sm:$0xff]  ;;  %v95_v40 = vld [vmem:[%s1037_s1 + $0x228] sm:$0xff]  ;;  %v105_v43 = vld [vmem:[%s1037_s1 + $0x278] sm:$0xff] }
  0x27   :  { %536 = vmatpush1.bf16.msra.mxu1 %v535_v52  ;;  %v568_v41 = vpack.c.bf16 %v95_v40, %v90_v39  ;;  %v110_v45 = vld [vmem:[%s1037_s1 + $0x2a0] sm:$0xff]  ;;  %v115_v46 = vld [vmem:[%s1037_s1 + $0x2c8] sm:$0xff]  ;;  %v120_v48 = vld [vmem:[%s1037_s1 + $0x2f0] sm:$0xff] }
  0x28   :  { %538 = vmatprep.subr.bf16.mxu1 %v537_v55  ;;  %v574_v47 = vpack.c.bf16 %v115_v46, %v110_v45  ;;  %v125_v49 = vld [vmem:[%s1037_s1 + $0x318] sm:$0xff]  ;;  %v130_v51 = vld [vmem:[%s1037_s1 + $0x340] sm:$0xff]  ;;  %v135_v52 = vld [vmem:[%s1037_s1 + $0x368] sm:$0xff] }
  0x29   :  { %492 = vmatpush1.bf16.msra.mxu0 %v491_v58  ;;  %v577_v50 = vpack.c.bf16 %v125_v49, %v120_v48  ;;  %v580_v53 = vpack.c.bf16 %v135_v52, %v130_v51  ;;  %v140_v54 = vld [vmem:[%s1037_s1 + $0x390] sm:$0xff]  ;;  %v145_v55 = vld [vmem:[%s1037_s1 + $0x3b8] sm:$0xff]  ;;  %v402_v57 = vld [vmem:[%s1040_s3] sm:$0xff] }
  0x2a   :  { %494 = vmatprep.subr.bf16.mxu0 %v493_v61  ;;  %v583_v56 = vpack.c.bf16 %v145_v55, %v140_v54  ;;  %405 = vperm.xlu1 %588, %v402_v57   ;;  %v413_v28 = vld [vmem:[%s1041_s4] sm:$0xff] }
  0x2b   :  { %540 = vmatpush1.bf16.msra.mxu1 %v539_v0 }
  0x2c   :  { %542 = vmatprep.subr.bf16.mxu1 %v541_v3 }
  0x2d   :  { %496 = vmatpush1.bf16.msra.mxu0 %v495_v6 }
  0x2e   :  { %498 = vmatprep.subr.bf16.mxu0 %v497_v10 }
  0x2f   :  { %544 = vmatpush1.bf16.msra.mxu1 %v543_v13 }
  0x30   :  { %546 = vmatprep.subr.bf16.mxu1 %v545_v14 }
  0x31   :  { %500 = vmatpush1.bf16.msra.mxu0 %v499_v17 }
  0x32   :  { %549 = vmatprep.subr.bf16.mxu0 %v592_v23 }
  0x33   :  { %548 = vmatpush1.bf16.msra.mxu1 %v547_v20 }
  0x34   :  { %221 = vmatmul.mubr.f32.vlgmr.msra.gmra.mrb[0].mxu0 %v937_v21 }
  0x35   :  { %551 = vmatpush1.bf16.msra.mxu0 %v550_v22  ;;  %452 = vmatprep.mubr.msk.f32.mxu0 %vm152_vm0, %v847_v42  ;;  %v100_v42 = vld [vmem:[%s1037_s1 + $0x250] sm:$0xff] }
  0x36   :  { %292 = vmatmul.mubr.f32.vlgmr.msra.gmra.mrb[0].mxu1 %v937_v21  ;;  %552 = vmatprep.subr.bf16.mxu0 %v592_v23  ;;  %v571_v44 = vpack.c.bf16 %v105_v43, %v100_v42 }
  0x39   :  { %554 = vmatpush1.bf16.msra.mxu0 %v553_v26 }
  0x3a   :  { %555 = vmatprep.subr.bf16.mxu0 %v592_v23 }
  0x3d   :  { %557 = vmatpush1.bf16.msra.mxu0 %v556_v29 }
  0x3e   :  { %558 = vmatprep.subr.bf16.mxu0 %v592_v23 }
  0x41   :  { %560 = vmatpush1.bf16.msra.mxu0 %v559_v32 }
  0x42   :  { %561 = vmatprep.subr.bf16.mxu0 %v592_v23 }
  0x45   :  { %563 = vmatpush1.bf16.msra.mxu0 %v562_v35 }
  0x46   :  { %564 = vmatprep.subr.bf16.mxu0 %v592_v23 }
  0x49   :  { %566 = vmatpush1.bf16.msra.mxu0 %v565_v38 }
  0x4a   :  { %567 = vmatprep.subr.bf16.mxu0 %v592_v23 }
  0x4d   :  { %569 = vmatpush1.bf16.msra.mxu0 %v568_v41 }
  0x4e   :  { %570 = vmatprep.subr.bf16.mxu0 %v592_v23 }
  0x51   :  { %572 = vmatpush1.bf16.msra.mxu0 %v571_v44  ;;  %v430_v44 = vstv %s1042_s5 }
  0x52   :  { %573 = vmatprep.subr.bf16.mxu0 %v592_v23 }
  0x55   :  { %575 = vmatpush1.bf16.msra.mxu0 %v574_v47 }
  0x56   :  { %576 = vmatprep.subr.bf16.mxu0 %v592_v23 }
  0x59   :  { %578 = vmatpush1.bf16.msra.mxu0 %v577_v50 }
  0x5a   :  { %579 = vmatprep.subr.bf16.mxu0 %v592_v23 }
  0x5d   :  { %581 = vmatpush1.bf16.msra.mxu0 %v580_v53 }
  0x5e   :  { %582 = vmatprep.subr.bf16.mxu0 %v592_v23 }
  0x61   :  { %584 = vmatpush1.bf16.msra.mxu0 %v583_v56 }
  0x64   :  { %363 = vmatmul.mubr.f32.vlgmr.msra.gmra.mrb[2].mxu0 %v937_v21 }
  0xa0   :  { %v150_v62 = vpop.permute.xlu0 %149 }
  0xa9   :  { %v406_v29 = vpop.permute.xlu1 %405 }
 0x107   :  { %v222_v58 = vpop.f32.mrb[0].mxu0 }
 0x108   :  { %v224_v59 = vpop.f32.mrb[1].mxu0  ;;  %v223_v63 = vadd.f32 %v222_v58, %v150_v62 }
 0x109   :  { %v293_v60 = vpop.f32.mrb[0].mxu1  ;;  %v225_v0 = vadd.f32 %v224_v59, %v150_v62 }
 0x10a   :  { %v295_v61 = vpop.f32.mrb[1].mxu1  ;;  %v294_v2 = vadd.f32 %v293_v60, %v150_v62 }
 0x10b   :  { %v368_v1 = vadd.f32 %v225_v0, %v223_v63  ;;  %v296_v4 = vadd.f32 %v295_v61, %v150_v62 }
 0x10d   :  { %v369_v3 = vadd.f32 %v368_v1, %v294_v2 }
 0x10f   :  { %v370_v8 = vadd.f32 %v369_v3, %v296_v4 }
 0x137   :  { %v364_v5 = vpop.f32.mrb[2].mxu0 }
 0x138   :  { %v365_v6 = vadd.f32 %v364_v5, %v150_v62  ;;  %v366_v7 = vpop.f32.mrb[3].mxu0 }
 0x13a   :  { %v372_v9 = vsel %vm371_vm1, %v365_v6, 0.0 }
 0x13b   :  { %v373_v10 = vadd.f32 %v372_v9, %v370_v8 }
 0x13d   :  { %374 = vadd.xlane.f32.xlu0 %v373_v10 }
 0x1ca   :  { %v375_v11 = vpop.xlane.xlu0 %374 }
 0x1cb   :  { %v376_v12 = vmul.f32 0.0018382353, %v375_v11 }
 0x1cd   :  { %v377_v13 = vsub.f32 %v223_v63, %v376_v12  ;;  %v378_v14 = vsub.f32 %v225_v0, %v376_v12  ;;  %v379_v15 = vsub.f32 %v294_v2, %v376_v12  ;;  %v381_v16 = vsub.f32 %v365_v6, %v376_v12 }
 0x1ce   :  { %v380_v17 = vsub.f32 %v296_v4, %v376_v12 }
 0x1cf   :  { %v382_v18 = vmul.f32 %v377_v13, %v377_v13  ;;  %v383_v19 = vmul.f32 %v378_v14, %v378_v14  ;;  %v384_v20 = vmul.f32 %v379_v15, %v379_v15  ;;  %v386_v22 = vmul.f32 %v381_v16, %v381_v16 }
 0x1d0   :  { %v385_v23 = vmul.f32 %v380_v17, %v380_v17 }
 0x1d1   :  { %v387_v21 = vadd.f32 %v383_v19, %v382_v18  ;;  %v390_v26 = vsel %vm371_vm1, %v386_v22, 0.0 }
 0x1d3   :  { %v388_v24 = vadd.f32 %v387_v21, %v384_v20 }
 0x1d5   :  { %v389_v25 = vadd.f32 %v388_v24, %v385_v23 }
 0x1d7   :  { %v391_v27 = vadd.f32 %v390_v26, %v389_v25 }
 0x1d9   :  { %392 = vadd.xlane.f32.xlu1 %v391_v27 }
 0x1ea   :  { %416 = vperm.xlu1 %588, %v413_v28  }
 0x266   :  { %v393_v30 = vpop.xlane.xlu1 %392 }
 0x267   :  { %v394_v31 = vmul.f32 0.0018382353, %v393_v30 }
 0x269   :  { %v395_v32 = vadd.f32 1e-05, %v394_v31 }
 0x26a   :  { %v417_v45 = vpop.permute.xlu1 %416 }
 0x26b   :  { %589 = vrsqrt.f32 %v395_v32 }
 0x275   :  { %v590_v33 = vpop.eup %589 }
 0x276   :  { %v397_v34 = vmul.f32 %v590_v33, %v377_v13  ;;  %v398_v35 = vmul.f32 %v590_v33, %v378_v14  ;;  %v399_v36 = vmul.f32 %v590_v33, %v379_v15  ;;  %v400_v37 = vmul.f32 %v590_v33, %v380_v17 }
 0x277   :  { %v401_v38 = vmul.f32 %v590_v33, %v381_v16 }
 0x278   :  { %v408_v39 = vmul.f32 %v406_v29, %v397_v34  ;;  %v409_v40 = vmul.f32 %v406_v29, %v398_v35  ;;  %v410_v41 = vmul.f32 %v406_v29, %v399_v36  ;;  %v411_v42 = vmul.f32 %v406_v29, %v400_v37 }
 0x279   :  { %v412_v43 = vmul.f32 %v406_v29, %v401_v38 }
 0x27a   :  { %v419_v46 = vadd.f32 %v417_v45, %v408_v39  ;;  %v420_v47 = vadd.f32 %v417_v45, %v409_v40  ;;  %v421_v48 = vadd.f32 %v417_v45, %v410_v41  ;;  %v422_v49 = vadd.f32 %v417_v45, %v411_v42 }
 0x27b   :  { %v423_v50 = vadd.f32 %v417_v45, %v412_v43 }
 0x27c   :  { %vm425_vm2 = vcmp.ge.f32.partialorder %v419_v46, 0.0  ;;  %vm426_vm3 = vcmp.ge.f32.partialorder %v420_v47, 0.0  ;;  %vm427_vm4 = vcmp.ge.f32.partialorder %v421_v48, 0.0  ;;  %vm428_vm5 = vcmp.ge.f32.partialorder %v422_v49, 0.0 }
 0x27d   :  { %vm429_vm6 = vcmp.ge.f32.partialorder %v423_v50, 0.0  ;;  %v431_v51 = vmul.f32 %v430_v44, %v419_v46  ;;  %v432_v52 = vmul.f32 %v430_v44, %v420_v47  ;;  %v433_v53 = vmul.f32 %v430_v44, %v421_v48 }
 0x27e   :  { %v434_v54 = vmul.f32 %v430_v44, %v422_v49  ;;  %v435_v55 = vmul.f32 %v430_v44, %v423_v50 }
 0x27f   :  { %v436_v56 = vsel %vm425_vm2, %v419_v46, %v431_v51  ;;  %v437_v57 = vsel %vm426_vm3, %v420_v47, %v432_v52  ;;  %v438_v58 = vsel %vm427_vm4, %v421_v48, %v433_v53 }
 0x280   :  { %v439_v59 = vsel %vm428_vm5, %v422_v49, %v434_v54  ;;  %v440_v60 = vsel %vm429_vm6, %v423_v50, %v435_v55  ;;  %441 = vst [vmem:[%s1043_s6] sm:$0xff] %v436_v56  ;;  %442 = vst [vmem:[%s1043_s6 + $0x8] sm:$0xff] %v437_v57 }
 0x281   :  { %443 = vst [vmem:[%s1043_s6 + $0x10] sm:$0xff] %v438_v58  ;;  %444 = vst [vmem:[%s1043_s6 + $0x18] sm:$0xff] %v439_v59 }
 0x282   :  { %445 = vst.msk [vmem:[%s1043_s6 + $0x20] sm:$0xff] %vm371_vm1, %v440_v60 }

// kernel: _lambda_.5
= control target key start
LH: loop header
LB: loop body
LE: loop exit
PB: predicated region body
PF: predicated region fallthrough
CT: control target
= control target key end

     0   :  { %v574_v3 = vmov 0.0   ;;  %v575_v8 = vmov 0   ;;  %vm105_vm0 = vcmask 1043456   ;;  %vm576_vm1 = vmmov 1   ;;  %s880_s1 = inlined_call_operand.vmem [shape: f32[108,544], index: 1, kind: input, shape index: {}]   ;;  %s881_s2 = inlined_call_operand.vmem [shape: f32[4,1], index: 2, kind: input, shape index: {}]   ;;  %s882_s0 = inlined_call_operand.vmem [shape: f32[4,108], index: 0, kind: input, shape index: {}]   ;;  %s883_s3 = inlined_call_operand.vmem [shape: f32[4,1], index: 3, kind: input, shape index: {}]   ;;  %s884_s4 = inlined_call_operand.vmem [shape: f32[4,1], index: 4, kind: input, shape index: {}]   ;;  %s885_s5 = inlined_call_operand.<no memory space> [shape: f32[1], index: 5, kind: input, shape index: {}]   ;;  %s886_s6 = inlined_call_operand.vmem [shape: f32[4,544], index: 6, kind: output, shape index: {}]  }
   0x1   :  { %v26_v0 = vld [vmem:[%s880_s1 + $0x8] sm:$0xff]  ;;  %v31_v1 = vld [vmem:[%s880_s1 + $0x30] sm:$0xff]  ;;  %v25_v2 = vld [vmem:[%s880_s1] sm:$0xff]  ;;  %185 = vmatprep.mubr.f32.mxu0 %v574_v3  ;;  %256 = vmatprep.mubr.f32.mxu1 %v574_v3  ;;  %vm101_vm3 = vcmask 883712   ;;  %vm578_vm4 = vmmov 0   ;;  %vm340_vm5 = vcmask 257024  }
   0x2   :  { %v483_v4 = vpack.c.bf16 %v31_v1, %v26_v0  ;;  %v30_v5 = vld [vmem:[%s880_s1 + $0x28] sm:$0xff]  ;;  %v28_v6 = vld [vmem:[%s880_s1 + $0x18] sm:$0xff]  ;;  %v33_v7 = vld [vmem:[%s880_s1 + $0x40] sm:$0xff]  ;;  %570 = vset.pattern.permute.xlu0 %v575_v8  ;;  %571 = vset.pattern.permute.xlu1 %v575_v8 }
   0x3   :  { %v485_v9 = vpack.c.bf16 %v30_v5, %v25_v2  ;;  %v513_v10 = vpack.c.bf16 %v33_v7, %v28_v6  ;;  %v36_v11 = vld [vmem:[%s880_s1 + $0x58] sm:$0xff]  ;;  %v41_v12 = vld [vmem:[%s880_s1 + $0x80] sm:$0xff]  ;;  %v27_v13 = vld [vmem:[%s880_s1 + $0x10] sm:$0xff] }
   0x4   :  { %484 = vmatprep.subr.bf16.mxu0 %v483_v4  ;;  %v487_v14 = vpack.c.bf16 %v41_v12, %v36_v11  ;;  %v32_v15 = vld [vmem:[%s880_s1 + $0x38] sm:$0xff]  ;;  %v35_v16 = vld [vmem:[%s880_s1 + $0x50] sm:$0xff]  ;;  %v38_v20 = vld [vmem:[%s880_s1 + $0x68] sm:$0xff] }
   0x5   :  { %v40_v17 = vld [vmem:[%s880_s1 + $0x78] sm:$0xff]  ;;  %486 = vmatpush1.bf16.msra.mxu0 %v485_v9  ;;  %514 = vmatprep.subr.bf16.mxu1 %v513_v10  ;;  %v515_v18 = vpack.c.bf16 %v32_v15, %v27_v13  ;;  %v43_v21 = vld [vmem:[%s880_s1 + $0x90] sm:$0xff]  ;;  %v46_v22 = vld [vmem:[%s880_s1 + $0xa8] sm:$0xff] }
   0x6   :  { %v489_v19 = vpack.c.bf16 %v40_v17, %v35_v16  ;;  %488 = vmatprep.subr.bf16.mxu0 %v487_v14  ;;  %v517_v23 = vpack.c.bf16 %v43_v21, %v38_v20  ;;  %v51_v24 = vld [vmem:[%s880_s1 + $0xd0] sm:$0xff]  ;;  %v37_v25 = vld [vmem:[%s880_s1 + $0x60] sm:$0xff]  ;;  %v42_v26 = vld [vmem:[%s880_s1 + $0x88] sm:$0xff] }
   0x7   :  { %516 = vmatpush1.bf16.msra.mxu1 %v515_v18  ;;  %v491_v27 = vpack.c.bf16 %v51_v24, %v46_v22  ;;  %v519_v28 = vpack.c.bf16 %v42_v26, %v37_v25  ;;  %v45_v29 = vld [vmem:[%s880_s1 + $0xa0] sm:$0xff]  ;;  %v50_v30 = vld [vmem:[%s880_s1 + $0xc8] sm:$0xff]  ;;  %v48_v31 = vld [vmem:[%s880_s1 + $0xb8] sm:$0xff] }
   0x8   :  { %518 = vmatprep.subr.bf16.mxu1 %v517_v23  ;;  %v53_v32 = vld [vmem:[%s880_s1 + $0xe0] sm:$0xff]  ;;  %v56_v33 = vld [vmem:[%s880_s1 + $0xf8] sm:$0xff]  ;;  %v493_v35 = vpack.c.bf16 %v50_v30, %v45_v29  ;;  %v47_v37 = vld [vmem:[%s880_s1 + $0xb0] sm:$0xff]  ;;  %v577_v29 = vmov 0.0|0.0  }
   0x9   :  { %v61_v34 = vld [vmem:[%s880_s1 + $0x120] sm:$0xff]  ;;  %490 = vmatpush1.bf16.msra.mxu0 %v489_v19  ;;  %v521_v36 = vpack.c.bf16 %v53_v32, %v48_v31  ;;  %v52_v38 = vld [vmem:[%s880_s1 + $0xd8] sm:$0xff]  ;;  %v55_v39 = vld [vmem:[%s880_s1 + $0xf0] sm:$0xff] }
   0xa   :  { %492 = vmatprep.subr.bf16.mxu0 %v491_v27  ;;  %v495_v40 = vpack.c.bf16 %v61_v34, %v56_v33  ;;  %v60_v41 = vld [vmem:[%s880_s1 + $0x118] sm:$0xff]  ;;  %v58_v42 = vld [vmem:[%s880_s1 + $0x108] sm:$0xff]  ;;  %v63_v43 = vld [vmem:[%s880_s1 + $0x130] sm:$0xff]  ;;  %v523_v44 = vpack.c.bf16 %v52_v38, %v47_v37 }
   0xb   :  { %520 = vmatpush1.bf16.msra.mxu1 %v519_v28  ;;  %v66_v45 = vld [vmem:[%s880_s1 + $0x148] sm:$0xff]  ;;  %v71_v46 = vld [vmem:[%s880_s1 + $0x170] sm:$0xff]  ;;  %v525_v47 = vpack.c.bf16 %v63_v43, %v58_v42  ;;  %v57_v48 = vld [vmem:[%s880_s1 + $0x100] sm:$0xff]  ;;  %v497_v50 = vpack.c.bf16 %v60_v41, %v55_v39 }
   0xc   :  { %522 = vmatprep.subr.bf16.mxu1 %v521_v36  ;;  %v62_v49 = vld [vmem:[%s880_s1 + $0x128] sm:$0xff]  ;;  %v68_v51 = vld [vmem:[%s880_s1 + $0x158] sm:$0xff]  ;;  %v73_v52 = vld [vmem:[%s880_s1 + $0x180] sm:$0xff]  ;;  %v499_v53 = vpack.c.bf16 %v71_v46, %v66_v45 }
   0xd   :  { %494 = vmatpush1.bf16.msra.mxu0 %v493_v35  ;;  %v65_v54 = vld [vmem:[%s880_s1 + $0x140] sm:$0xff]  ;;  %v70_v55 = vld [vmem:[%s880_s1 + $0x168] sm:$0xff]  ;;  %v527_v56 = vpack.c.bf16 %v62_v49, %v57_v48  ;;  %v76_v57 = vld [vmem:[%s880_s1 + $0x198] sm:$0xff]  ;;  %v529_v59 = vpack.c.bf16 %v73_v52, %v68_v51 }
   0xe   :  { %496 = vmatprep.subr.bf16.mxu0 %v495_v40  ;;  %v81_v58 = vld [vmem:[%s880_s1 + $0x1c0] sm:$0xff]  ;;  %v67_v60 = vld [vmem:[%s880_s1 + $0x150] sm:$0xff]  ;;  %v72_v61 = vld [vmem:[%s880_s1 + $0x178] sm:$0xff]  ;;  %v501_v62 = vpack.c.bf16 %v70_v55, %v65_v54 }
   0xf   :  { %524 = vmatpush1.bf16.msra.mxu1 %v523_v44  ;;  %v78_v63 = vld [vmem:[%s880_s1 + $0x1a8] sm:$0xff]  ;;  %v83_v0 = vld [vmem:[%s880_s1 + $0x1d0] sm:$0xff]  ;;  %v503_v1 = vpack.c.bf16 %v81_v58, %v76_v57  ;;  %v80_v4 = vld [vmem:[%s880_s1 + $0x1b8] sm:$0xff]  ;;  %v531_v5 = vpack.c.bf16 %v72_v61, %v67_v60 }
  0x10   :  { %526 = vmatprep.subr.bf16.mxu1 %v525_v47  ;;  %v75_v2 = vld [vmem:[%s880_s1 + $0x190] sm:$0xff]  ;;  %v86_v6 = vld [vmem:[%s880_s1 + $0x1e8] sm:$0xff]  ;;  %v533_v8 = vpack.c.bf16 %v83_v0, %v78_v63  ;;  %v77_v9 = vld [vmem:[%s880_s1 + $0x1a0] sm:$0xff] }
  0x11   :  { %498 = vmatpush1.bf16.msra.mxu0 %v497_v50  ;;  %v91_v7 = vld [vmem:[%s880_s1 + $0x210] sm:$0xf]  ;;  %v82_v10 = vld [vmem:[%s880_s1 + $0x1c8] sm:$0xff]  ;;  %v505_v11 = vpack.c.bf16 %v80_v4, %v75_v2  ;;  %v88_v12 = vld [vmem:[%s880_s1 + $0x1f8] sm:$0xff] }
  0x12   :  { %500 = vmatprep.subr.bf16.mxu0 %v499_v53  ;;  %v93_v13 = vld [vmem:[%s880_s1 + $0x220] sm:$0xf]  ;;  %v507_v14 = vpack.c.bf16 %v91_v7, %v86_v6  ;;  %v90_v16 = vld [vmem:[%s880_s1 + $0x208] sm:$0xf]  ;;  %vm779_vm2 = vmpackc.low %vm105_vm0, %vm576_vm1  ;;  %v535_v18 = vpack.c.bf16 %v82_v10, %v77_v9 }
  0x13   :  { %528 = vmatpush1.bf16.msra.mxu1 %v527_v56  ;;  %v85_v15 = vld [vmem:[%s880_s1 + $0x1e0] sm:$0xff]  ;;  %v537_v19 = vpack.c.bf16 %v93_v13, %v88_v12  ;;  %v87_v20 = vld [vmem:[%s880_s1 + $0x1f0] sm:$0xff]  ;;  %v92_v21 = vld [vmem:[%s880_s1 + $0x218] sm:$0xf] }
  0x14   :  { %530 = vmatprep.subr.bf16.mxu1 %v529_v59  ;;  %v510_v22 = vpack.c.bf16 %v90_v16, %v85_v15  ;;  %v95_v23 = vld [vmem:[%s881_s2] sm:$0xf]  ;;  %v34_v25 = vld [vmem:[%s880_s1 + $0x48] sm:$0xff]  ;;  %v540_v26 = vpack.c.bf16 %v92_v21, %v87_v20  ;;  %v39_v30 = vld [vmem:[%s880_s1 + $0x70] sm:$0xff] }
  0x15   :  { %502 = vmatpush1.bf16.msra.mxu0 %v501_v62  ;;  %v29_v24 = vld [vmem:[%s880_s1 + $0x20] sm:$0xff]  ;;  %98 = vperm.xlu0 %570, %v95_v23   ;;  %v44_v31 = vld [vmem:[%s880_s1 + $0x98] sm:$0xff]  ;;  %v54_v34 = vld [vmem:[%s880_s1 + $0xe8] sm:$0xff] }
  0x16   :  { %504 = vmatprep.subr.bf16.mxu0 %v503_v1  ;;  %v24_v27 = vld [vmem:[%s882_s0] sm:$0xf]  ;;  %v544_v28 = vpack.c.bf16 %v34_v25, %v29_v24  ;;  %v547_v32 = vpack.c.bf16 %v44_v31, %v39_v30  ;;  %v59_v36 = vld [vmem:[%s880_s1 + $0x110] sm:$0xff]  ;;  %v74_v39 = vld [vmem:[%s880_s1 + $0x188] sm:$0xff] }
  0x17   :  { %532 = vmatpush1.bf16.msra.mxu1 %v531_v5  ;;  %v49_v33 = vld [vmem:[%s880_s1 + $0xc0] sm:$0xff]  ;;  %v79_v41 = vld [vmem:[%s880_s1 + $0x1b0] sm:$0xff]  ;;  %v84_v42 = vld [vmem:[%s880_s1 + $0x1d8] sm:$0xff] }
  0x18   :  { %534 = vmatprep.subr.bf16.mxu1 %v533_v8  ;;  %v550_v35 = vpack.c.bf16 %v54_v34, %v49_v33  ;;  %v69_v38 = vld [vmem:[%s880_s1 + $0x160] sm:$0xff]  ;;  %v559_v43 = vpack.c.bf16 %v84_v42, %v79_v41  ;;  %v94_v45 = vld [vmem:[%s880_s1 + $0x228] sm:$0xf]  ;;  %v403_v42 = vstv %s885_s5 }
  0x19   :  { %506 = vmatpush1.bf16.msra.mxu0 %v505_v11  ;;  %v556_v40 = vpack.c.bf16 %v74_v39, %v69_v38  ;;  %v89_v44 = vld [vmem:[%s880_s1 + $0x200] sm:$0xff] }
  0x1a   :  { %509 = vmatprep.subr.msk.bf16.mxu0 %vm779_vm2, %v507_v14  ;;  %v562_v46 = vpack.c.bf16 %v94_v45, %v89_v44  ;;  %v375_v47 = vld [vmem:[%s883_s3] sm:$0xf] }
  0x1b   :  { %536 = vmatpush1.bf16.msra.mxu1 %v535_v18  ;;  %378 = vperm.xlu1 %571, %v375_v47  }
  0x1c   :  { %539 = vmatprep.subr.msk.bf16.mxu1 %vm779_vm2, %v537_v19 }
  0x1d   :  { %512 = vmatpush1.bf16.msk.msra.mxu0 %vm779_vm2, %v510_v22 }
  0x1e   :  { %543 = vmatprep.subr.bf16.mxu0 %v577_v29 }
  0x1f   :  { %542 = vmatpush1.bf16.msk.msra.mxu1 %vm779_vm2, %v540_v26 }
  0x20   :  { %431 = vmatmul.mubr.msk.f32.vlgmr.msra.gmra.mrb[0].mxu0 %vm101_vm3, %v24_v27 }
  0x21   :  { %545 = vmatpush3.bf16.msra.mxu0 %v544_v28  ;;  %480 = vmatprep.mubr.msk.f32.mxu0 %vm578_vm4, %v574_v3  ;;  %v64_v3 = vld [vmem:[%s880_s1 + $0x138] sm:$0xff] }
  0x22   :  { %434 = vmatmul.mubr.msk.f32.vlgmr.msra.gmra.mrb[0].mxu1 %vm101_vm3, %v24_v27  ;;  %546 = vmatprep.subr.bf16.mxu0 %v577_v29  ;;  %v553_v37 = vpack.c.bf16 %v64_v3, %v59_v36 }
  0x25   :  { %548 = vmatpush3.bf16.msra.mxu0 %v547_v32 }
  0x26   :  { %549 = vmatprep.subr.bf16.mxu0 %v577_v29 }
  0x29   :  { %551 = vmatpush3.bf16.msra.mxu0 %v550_v35 }
  0x2a   :  { %552 = vmatprep.subr.bf16.mxu0 %v577_v29 }
  0x2d   :  { %554 = vmatpush3.bf16.msra.mxu0 %v553_v37 }
  0x2e   :  { %555 = vmatprep.subr.bf16.mxu0 %v577_v29 }
  0x31   :  { %557 = vmatpush3.bf16.msra.mxu0 %v556_v40 }
  0x32   :  { %558 = vmatprep.subr.bf16.mxu0 %v577_v29 }
  0x35   :  { %560 = vmatpush3.bf16.msra.mxu0 %v559_v43 }
  0x36   :  { %561 = vmatprep.subr.bf16.mxu0 %v577_v29 }
  0x39   :  { %564 = vmatpush3.bf16.msk.msra.mxu0 %vm779_vm2, %v562_v46 }
  0x3c   :  { %481 = vmatmul.mubr.msk.f32.vlgmr.msra.gmra.mrb[2].mxu0 %vm101_vm3, %v24_v27  ;;  %v386_v27 = vld [vmem:[%s884_s4] sm:$0xf] }
  0x94   :  { %v99_v52 = vpop.permute.xlu0 %98 }
  0x9a   :  { %v379_v28 = vpop.permute.xlu1 %378 }
  0xf3   :  { %v187_v48 = vpop.f32.mrb[0].mxu0 }
  0xf4   :  { %v189_v49 = vpop.f32.mrb[1].mxu0  ;;  %v188_v53 = vadd.f32 %v187_v48, %v99_v52 }
  0xf5   :  { %v258_v50 = vpop.f32.mrb[0].mxu1  ;;  %v190_v54 = vadd.f32 %v189_v49, %v99_v52 }
  0xf6   :  { %v260_v51 = vpop.f32.mrb[1].mxu1  ;;  %v333_v55 = vsel %vm105_vm0, %v188_v53, 0.0  ;;  %v259_v57 = vadd.f32 %v258_v50, %v99_v52 }
  0xf7   :  { %v334_v56 = vsel %vm105_vm0, %v190_v54, 0.0  ;;  %v261_v60 = vadd.f32 %v260_v51, %v99_v52 }
  0xf8   :  { %v335_v58 = vadd.f32 %v334_v56, %v333_v55  ;;  %v336_v59 = vsel %vm105_vm0, %v259_v57, 0.0 }
  0xf9   :  { %v338_v62 = vsel %vm105_vm0, %v261_v60, 0.0 }
  0xfa   :  { %v337_v61 = vadd.f32 %v336_v59, %v335_v58 }
  0xfc   :  { %v339_v2 = vadd.f32 %v338_v62, %v337_v61 }
 0x10f   :  { %v329_v63 = vpop.f32.mrb[2].mxu0 }
 0x110   :  { %v330_v0 = vadd.f32 %v329_v63, %v99_v52  ;;  %v482_v1 = vpop.f32.mrb[3].mxu0 }
 0x112   :  { %v341_v4 = vsel %vm340_vm5, %v330_v0, 0.0 }
 0x113   :  { %v342_v5 = vadd.f32 %v341_v4, %v339_v2 }
 0x115   :  { %343 = vadd.xlane.f32.xlu0 %v342_v5 }
 0x1a2   :  { %v344_v6 = vpop.xlane.xlu0 %343 }
 0x1a3   :  { %v345_v7 = vmul.f32 0.0018382353, %v344_v6 }
 0x1a5   :  { %v346_v8 = vsub.f32 %v188_v53, %v345_v7  ;;  %v347_v9 = vsub.f32 %v190_v54, %v345_v7  ;;  %v348_v10 = vsub.f32 %v259_v57, %v345_v7  ;;  %v349_v11 = vsub.f32 %v261_v60, %v345_v7 }
 0x1a6   :  { %v350_v12 = vsub.f32 %v330_v0, %v345_v7 }
 0x1a7   :  { %v351_v13 = vmul.f32 %v346_v8, %v346_v8  ;;  %v352_v14 = vmul.f32 %v347_v9, %v347_v9  ;;  %v353_v15 = vmul.f32 %v348_v10, %v348_v10  ;;  %v354_v16 = vmul.f32 %v349_v11, %v349_v11 }
 0x1a8   :  { %v355_v20 = vmul.f32 %v350_v12, %v350_v12 }
 0x1a9   :  { %v356_v17 = vsel %vm105_vm0, %v351_v13, 0.0  ;;  %v357_v18 = vsel %vm105_vm0, %v352_v14, 0.0  ;;  %v359_v21 = vsel %vm105_vm0, %v353_v15, 0.0  ;;  %v361_v23 = vsel %vm105_vm0, %v354_v16, 0.0 }
 0x1aa   :  { %v358_v19 = vadd.f32 %v357_v18, %v356_v17  ;;  %v363_v25 = vsel %vm340_vm5, %v355_v20, 0.0 }
 0x1ac   :  { %v360_v22 = vadd.f32 %v359_v21, %v358_v19 }
 0x1ae   :  { %v362_v24 = vadd.f32 %v361_v23, %v360_v22 }
 0x1b0   :  { %v364_v26 = vadd.f32 %v363_v25, %v362_v24 }
 0x1b2   :  { %365 = vadd.xlane.f32.xlu1 %v364_v26 }
 0x1c3   :  { %389 = vperm.xlu1 %571, %v386_v27  }
 0x23f   :  { %v366_v29 = vpop.xlane.xlu1 %365 }
 0x240   :  { %v367_v30 = vmul.f32 0.0018382353, %v366_v29 }
 0x242   :  { %v368_v31 = vadd.f32 1e-05, %v367_v30 }
 0x243   :  { %v390_v43 = vpop.permute.xlu1 %389 }
 0x244   :  { %572 = vrsqrt.f32 %v368_v31 }
 0x24e   :  { %v573_v32 = vpop.eup %572 }
 0x24f   :  { %v370_v33 = vmul.f32 %v573_v32, %v346_v8  ;;  %v371_v34 = vmul.f32 %v573_v32, %v347_v9  ;;  %v372_v35 = vmul.f32 %v573_v32, %v348_v10  ;;  %v373_v36 = vmul.f32 %v573_v32, %v349_v11 }
 0x250   :  { %v374_v3 = vmul.f32 %v573_v32, %v350_v12 }
 0x251   :  { %v381_v37 = vmul.f32 %v379_v28, %v370_v33  ;;  %v382_v38 = vmul.f32 %v379_v28, %v371_v34  ;;  %v383_v39 = vmul.f32 %v379_v28, %v372_v35  ;;  %v384_v40 = vmul.f32 %v379_v28, %v373_v36 }
 0x252   :  { %v385_v41 = vmul.f32 %v379_v28, %v374_v3 }
 0x253   :  { %v392_v44 = vadd.f32 %v390_v43, %v381_v37  ;;  %v393_v45 = vadd.f32 %v390_v43, %v382_v38  ;;  %v394_v46 = vadd.f32 %v390_v43, %v383_v39  ;;  %v395_v47 = vadd.f32 %v390_v43, %v384_v40 }
 0x254   :  { %v396_v48 = vadd.f32 %v390_v43, %v385_v41 }
 0x255   :  { %vm398_vm6 = vcmp.ge.f32.partialorder %v392_v44, 0.0  ;;  %vm399_vm7 = vcmp.ge.f32.partialorder %v393_v45, 0.0  ;;  %vm400_vm8 = vcmp.ge.f32.partialorder %v394_v46, 0.0  ;;  %vm401_vm9 = vcmp.ge.f32.partialorder %v395_v47, 0.0 }
 0x256   :  { %vm402_vm10 = vcmp.ge.f32.partialorder %v396_v48, 0.0  ;;  %v404_v49 = vmul.f32 %v403_v42, %v392_v44  ;;  %v405_v50 = vmul.f32 %v403_v42, %v393_v45  ;;  %v406_v51 = vmul.f32 %v403_v42, %v394_v46 }
 0x257   :  { %v407_v52 = vmul.f32 %v403_v42, %v395_v47  ;;  %v408_v53 = vmul.f32 %v403_v42, %v396_v48 }
 0x258   :  { %v409_v54 = vsel %vm398_vm6, %v392_v44, %v404_v49  ;;  %v410_v55 = vsel %vm399_vm7, %v393_v45, %v405_v50  ;;  %v411_v56 = vsel %vm400_vm8, %v394_v46, %v406_v51 }
 0x259   :  { %v412_v57 = vsel %vm401_vm9, %v395_v47, %v407_v52  ;;  %v413_v58 = vsel %vm402_vm10, %v396_v48, %v408_v53  ;;  %v418_v59 = vcombine.low %v409_v54, %v410_v55 }
 0x25a   :  { %v419_v60 = vcombine.low %v411_v56, %v412_v57  ;;  %424 = vst.msk [vmem:[%s886_s6 + $0x10] sm:$0xf] %vm340_vm5, %v413_v58 }
 0x25b   :  { %422 = vst [vmem:[%s886_s6] sm:$0xff] %v418_v59 }
 0x25c   :  { %423 = vst [vmem:[%s886_s6 + $0x8] sm:$0xff] %v419_v60 }

</bundles_post_ra>
